<compile_context>
chip_gen: v6e
topology: v6e:2x2x1
jax: 0.10.0
libtpu: 0.0.40
codegen_flags: <defaults>
</compile_context>

<pallas_src>
import jax
import jax.numpy as jnp
from jax.experimental import pallas as pl
from jax.experimental.pallas import tpu as pltpu


A_PAD = 128  # fc3 output padded to a full lane-dense vreg width


def _round_up(n: int, m: int) -> int:
    return ((n + m - 1) // m) * m


def qnetwork_kernel(x_ref, w1_ref, b1_ref, w2_ref, b2_ref, w3_ref, b3_ref, o_ref):
    # One batch tile per grid step; weights/biases are VMEM-resident across steps
    # (their index_maps always return block (0, 0), so no re-DMA).
    x = x_ref[...].astype(jnp.bfloat16)                                # (TB, S)

    h1 = jnp.dot(x, w1_ref[...], preferred_element_type=jnp.float32) + b1_ref[...]
    h1 = jnp.maximum(h1, 0.0).astype(jnp.bfloat16)                     # (TB, 64)

    h2 = jnp.dot(h1, w2_ref[...], preferred_element_type=jnp.float32) + b2_ref[...]
    h2 = jnp.maximum(h2, 0.0).astype(jnp.bfloat16)                     # (TB, 64)

    o_ref[...] = (
        jnp.dot(h2, w3_ref[...], preferred_element_type=jnp.float32) + b3_ref[...]
    ).astype(o_ref.dtype)                                              # (TB, 128) bf16


def _qnetwork_jnp(x, params):
    """Plain-JAX path with the same dtype flow as the kernel.
    Used as the correctness reference and as the tiny-batch fallback."""
    A = params["action_size"]
    xb = x.astype(jnp.bfloat16)
    h1 = jnp.maximum(
        jnp.dot(xb, params["w1"], preferred_element_type=jnp.float32) + params["b1"], 0.0
    ).astype(jnp.bfloat16)
    h2 = jnp.maximum(
        jnp.dot(h1, params["w2"], preferred_element_type=jnp.float32) + params["b2"], 0.0
    ).astype(jnp.bfloat16)
    o = jnp.dot(h2, params["w3"], preferred_element_type=jnp.float32) + params["b3"]
    return o[:, :A]


def qnetwork_forward(x, params, *, max_tile_b: int = 8192, small_batch_fallback: int = 0):
    """x: (B, state_size) float32. params: dict from init_qnetwork_params.
    Returns (B, action_size) float32 Q-values."""
    B, S = x.shape
    A = params["action_size"]

    if B < small_batch_fallback:
        # Action-selection-sized batches: skip pallas_call fixed cost entirely.
        return _qnetwork_jnp(x, params).astype(jnp.float32)

    H1 = params["w1"].shape[1]
    H2 = params["w2"].shape[1]

    # Batch tiling: multiples of 16 (bf16 sublane packing); >= 2 grid steps for large B
    # so v7x's two TensorCores both get work; ragged tail handled by the cdiv grid.
    b16 = _round_up(max(B, 16), 16)
    tile_b = max(16, min(max_tile_b, _round_up(pl.cdiv(b16, 2), 16)))
    grid = (pl.cdiv(B, tile_b),)

    x_spec = pl.BlockSpec((tile_b, S), lambda i: (i, 0))
    o_spec = pl.BlockSpec((tile_b, A_PAD), lambda i: (i, 0))
    resident = lambda a: pl.BlockSpec(a.shape, lambda i: (0, 0))  # VMEM-resident weights

    weights = (params["w1"], params["b1"], params["w2"], params["b2"],
               params["w3"], params["b3"])

    flops = 2 * B * (S * H1 + H1 * H2 + H2 * A_PAD)
    weight_bytes = sum(int(a.size) * a.dtype.itemsize for a in weights)
    bytes_accessed = B * S * 4 + B * A_PAD * 2 + weight_bytes

    out_padded = pl.pallas_call(
        qnetwork_kernel,
        out_shape=jax.ShapeDtypeStruct((B, A_PAD), jnp.bfloat16),
        grid=grid,
        in_specs=[x_spec] + [resident(a) for a in weights],
        out_specs=o_spec,
        compiler_params=pltpu.CompilerParams(
            dimension_semantics=("parallel",),
            vmem_limit_bytes=32 * 1024 * 1024,  # footprint is single-digit MiB everywhere
        ),
        cost_estimate=pl.CostEstimate(
            flops=flops, transcendentals=0, bytes_accessed=bytes_accessed
        ),
    )(x, *weights)

    # Slice off the lane padding; cast the small (B, A) result back to f32 for callers.
    return out_padded[:, :A].astype(jnp.float32)


def init_qnetwork_params(key, state_size, action_size, fc1_units=64, fc2_units=64):
    """Mirrors PyTorch nn.Linear default init: U(-1/sqrt(fan_in), 1/sqrt(fan_in)).
    Weights stored transposed vs. PyTorch, i.e. (in, out), in bf16; biases f32 (1, out).
    fc3 weight/bias are zero-padded to A_PAD=128 output lanes once here (a no-op on the
    first `action_size` columns; the forward wrapper slices them back out)."""
    def linear(k, fan_in, fan_out):
        kw, kb = jax.random.split(k)
        bound = 1.0 / jnp.sqrt(jnp.float32(fan_in))
        w = jax.random.uniform(kw, (fan_in, fan_out), jnp.float32, -bound, bound)
        b = jax.random.uniform(kb, (1, fan_out), jnp.float32, -bound, bound)
        return w.astype(jnp.bfloat16), b

    k1, k2, k3 = jax.random.split(key, 3)
    w1, b1 = linear(k1, state_size, fc1_units)
    w2, b2 = linear(k2, fc1_units, fc2_units)
    w3, b3 = linear(k3, fc2_units, action_size)
    w3 = jnp.pad(w3, ((0, 0), (0, A_PAD - action_size)))
    b3 = jnp.pad(b3, ((0, 0), (0, A_PAD - action_size)))
    return {"w1": w1, "b1": b1, "w2": w2, "b2": b2, "w3": w3, "b3": b3,
            "action_size": action_size}


if __name__ == "__main__":
    # LunarLander-v2: state_size=8, action_size=4; small batch of states.
    state_size, action_size = 8, 4
    batch = 2

    key = jax.random.PRNGKey(0)
    k_params, k_x = jax.random.split(key)

    params = init_qnetwork_params(k_params, state_size, action_size)
    x = jax.random.normal(k_x, (batch, state_size), jnp.float32)

    out = jax.block_until_ready(qnetwork_forward(x, params))
    ref = _qnetwork_jnp(x, params)
    assert out.shape == (batch, action_size)
    assert jnp.allclose(out, ref, atol=1e-2, rtol=1e-2), (
        f"max abs err {jnp.max(jnp.abs(out - ref))}"
    )

    # Training-sized batch with a non-divisible tail: 2 parallel grid steps + ragged
    # last block (padded rows never written back).
    big_b = 1111
    xb = jax.random.normal(jax.random.PRNGKey(1), (big_b, state_size), jnp.float32)
    out_big = jax.block_until_ready(qnetwork_forward(xb, params))
    ref_big = _qnetwork_jnp(xb, params)
    assert out_big.shape == (big_b, action_size)
    assert jnp.allclose(out_big, ref_big, atol=1e-2, rtol=1e-2)

    # Tiny-batch action-selection path: bypass the kernel entirely.
    out_small = jax.block_until_ready(
        qnetwork_forward(x, params, small_batch_fallback=64))
    assert jnp.allclose(out_small, ref, atol=1e-2, rtol=1e-2)

    # TODO(synk): the transposed feature-major layout (batch on lanes, A padded to 8
    # sublanes) would cut writeback another ~8-16x but changes the caller-facing layout.

    print("KERNEL_OK")
</pallas_src>

<mosaic_0001>
module attributes {stable_mosaic.version = 11 : i64} {
  func.func @qnetwork_kernel(%arg0: i32, %arg1: memref<16x8xf32, #tpu.memory_space<vmem>>, %arg2: memref<8x64xbf16, #tpu.memory_space<vmem>>, %arg3: memref<1x64xf32, #tpu.memory_space<vmem>>, %arg4: memref<64x64xbf16, #tpu.memory_space<vmem>>, %arg5: memref<1x64xf32, #tpu.memory_space<vmem>>, %arg6: memref<64x128xbf16, #tpu.memory_space<vmem>>, %arg7: memref<1x128xf32, #tpu.memory_space<vmem>>, %arg8: memref<16x128xbf16, #tpu.memory_space<vmem>>) attributes {dimension_semantics = [#tpu.dimension_semantics<parallel>], iteration_bounds = array<i64: 1>, scalar_prefetch = 0 : i64, scratch_operands = 0 : i64, tpu.core_type = #tpu.core_type<tc>, window_params = [{transform_indices = @transform_0, window_bounds = array<i64: 16, 8>}, {pipeline_mode = #tpu.pipeline_mode<synchronous>, transform_indices = @transform_1, window_bounds = array<i64: 8, 64>}, {pipeline_mode = #tpu.pipeline_mode<synchronous>, transform_indices = @transform_2, window_bounds = array<i64: 1, 64>}, {pipeline_mode = #tpu.pipeline_mode<synchronous>, transform_indices = @transform_3, window_bounds = array<i64: 64, 64>}, {pipeline_mode = #tpu.pipeline_mode<synchronous>, transform_indices = @transform_4, window_bounds = array<i64: 1, 64>}, {pipeline_mode = #tpu.pipeline_mode<synchronous>, transform_indices = @transform_5, window_bounds = array<i64: 64, 128>}, {pipeline_mode = #tpu.pipeline_mode<synchronous>, transform_indices = @transform_6, window_bounds = array<i64: 1, 128>}, {transform_indices = @transform_7, window_bounds = array<i64: 16, 128>}]} {
    %c0 = arith.constant 0 : index
    %c0_0 = arith.constant 0 : index
    %0 = vector.load %arg1[%c0, %c0_0] : memref<16x8xf32, #tpu.memory_space<vmem>>, vector<16x8xf32>
    %1 = arith.truncf %0 : vector<16x8xf32> to vector<16x8xbf16>
    %c0_1 = arith.constant 0 : index
    %c0_2 = arith.constant 0 : index
    %2 = vector.load %arg2[%c0_1, %c0_2] : memref<8x64xbf16, #tpu.memory_space<vmem>>, vector<8x64xbf16>
    %cst = arith.constant dense<0.000000e+00> : vector<16x64xf32>
    %3 = tpu.matmul %1, %2, %cst {dimension_numbers = #tpu.dot_dimension_numbers<[1], [0], [0], [1], [0, 0, 1, 1], [], []>} : vector<16x8xbf16>, vector<8x64xbf16>, vector<16x64xf32> -> vector<16x64xf32>
    %c0_3 = arith.constant 0 : index
    %c0_4 = arith.constant 0 : index
    %4 = vector.load %arg3[%c0_3, %c0_4] : memref<1x64xf32, #tpu.memory_space<vmem>>, vector<1x64xf32>
    %5 = vector.broadcast %4 : vector<1x64xf32> to vector<16x64xf32>
    %6 = arith.addf %3, %5 : vector<16x64xf32>
    %cst_5 = arith.constant 0.000000e+00 : f32
    %7 = vector.broadcast %cst_5 : f32 to vector<16x64xf32>
    %8 = arith.maximumf %6, %7 : vector<16x64xf32>
    %9 = arith.truncf %8 : vector<16x64xf32> to vector<16x64xbf16>
    %c0_6 = arith.constant 0 : index
    %c0_7 = arith.constant 0 : index
    %10 = vector.load %arg4[%c0_6, %c0_7] : memref<64x64xbf16, #tpu.memory_space<vmem>>, vector<64x64xbf16>
    %cst_8 = arith.constant dense<0.000000e+00> : vector<16x64xf32>
    %11 = tpu.matmul %9, %10, %cst_8 {dimension_numbers = #tpu.dot_dimension_numbers<[1], [0], [0], [1], [0, 0, 1, 1], [], []>} : vector<16x64xbf16>, vector<64x64xbf16>, vector<16x64xf32> -> vector<16x64xf32>
    %c0_9 = arith.constant 0 : index
    %c0_10 = arith.constant 0 : index
    %12 = vector.load %arg5[%c0_9, %c0_10] : memref<1x64xf32, #tpu.memory_space<vmem>>, vector<1x64xf32>
    %13 = vector.broadcast %12 : vector<1x64xf32> to vector<16x64xf32>
    %14 = arith.addf %11, %13 : vector<16x64xf32>
    %cst_11 = arith.constant 0.000000e+00 : f32
    %15 = vector.broadcast %cst_11 : f32 to vector<16x64xf32>
    %16 = arith.maximumf %14, %15 : vector<16x64xf32>
    %17 = arith.truncf %16 : vector<16x64xf32> to vector<16x64xbf16>
    %c0_12 = arith.constant 0 : index
    %c0_13 = arith.constant 0 : index
    %18 = vector.load %arg6[%c0_12, %c0_13] : memref<64x128xbf16, #tpu.memory_space<vmem>>, vector<64x128xbf16>
    %cst_14 = arith.constant dense<0.000000e+00> : vector<16x128xf32>
    %19 = tpu.matmul %17, %18, %cst_14 {dimension_numbers = #tpu.dot_dimension_numbers<[1], [0], [0], [1], [0, 0, 1, 1], [], []>} : vector<16x64xbf16>, vector<64x128xbf16>, vector<16x128xf32> -> vector<16x128xf32>
    %c0_15 = arith.constant 0 : index
    %c0_16 = arith.constant 0 : index
    %20 = vector.load %arg7[%c0_15, %c0_16] : memref<1x128xf32, #tpu.memory_space<vmem>>, vector<1x128xf32>
    %21 = vector.broadcast %20 : vector<1x128xf32> to vector<16x128xf32>
    %22 = arith.addf %19, %21 : vector<16x128xf32>
    %23 = arith.truncf %22 : vector<16x128xf32> to vector<16x128xbf16>
    %c0_17 = arith.constant 0 : index
    %c0_18 = arith.constant 0 : index
    %24 = vector.load %arg8[%c0_17, %c0_18] : memref<16x128xbf16, #tpu.memory_space<vmem>>, vector<16x128xbf16>
    tpu.vector_store %arg8[%c0_17, %c0_18], %23 {strides = array<i32>} : memref<16x128xbf16, #tpu.memory_space<vmem>>, vector<16x128xbf16>,
    return
  }
  func.func @transform_0(%arg0: i32) -> (i32, i32) {
    %c0_i32 = arith.constant 0 : i32
    %c0_i32_0 = arith.constant 0 : i32
    return %arg0, %c0_i32 : i32, i32
  }
  func.func @transform_1(%arg0: i32) -> (i32, i32) {
    %c0_i32 = arith.constant 0 : i32
    %c0_i32_0 = arith.constant 0 : i32
    %c0_i32_1 = arith.constant 0 : i32
    return %c0_i32, %c0_i32_0 : i32, i32
  }
  func.func @transform_2(%arg0: i32) -> (i32, i32) {
    %c0_i32 = arith.constant 0 : i32
    %c0_i32_0 = arith.constant 0 : i32
    %c0_i32_1 = arith.constant 0 : i32
    return %c0_i32, %c0_i32_0 : i32, i32
  }
  func.func @transform_3(%arg0: i32) -> (i32, i32) {
    %c0_i32 = arith.constant 0 : i32
    %c0_i32_0 = arith.constant 0 : i32
    %c0_i32_1 = arith.constant 0 : i32
    return %c0_i32, %c0_i32_0 : i32, i32
  }
  func.func @transform_4(%arg0: i32) -> (i32, i32) {
    %c0_i32 = arith.constant 0 : i32
    %c0_i32_0 = arith.constant 0 : i32
    %c0_i32_1 = arith.constant 0 : i32
    return %c0_i32, %c0_i32_0 : i32, i32
  }
  func.func @transform_5(%arg0: i32) -> (i32, i32) {
    %c0_i32 = arith.constant 0 : i32
    %c0_i32_0 = arith.constant 0 : i32
    %c0_i32_1 = arith.constant 0 : i32
    return %c0_i32, %c0_i32_0 : i32, i32
  }
  func.func @transform_6(%arg0: i32) -> (i32, i32) {
    %c0_i32 = arith.constant 0 : i32
    %c0_i32_0 = arith.constant 0 : i32
    %c0_i32_1 = arith.constant 0 : i32
    return %c0_i32, %c0_i32_0 : i32, i32
  }
  func.func @transform_7(%arg0: i32) -> (i32, i32) {
    %c0_i32 = arith.constant 0 : i32
    %c0_i32_0 = arith.constant 0 : i32
    return %arg0, %c0_i32 : i32, i32
  }
}

</mosaic_0001>

<bundles_post_ra>
// kernel: tpu_custom_call.1
= control target key start
LH: loop header
LB: loop body
LE: loop exit
PB: predicated region body
PF: predicated region fallthrough
CT: control target
= control target key end

     0   :  { %12 = vsyncpa [#allocation3], 0  ;;  %s674_s0 = inlined_call_operand.hbm [shape: f32[2,8], index: 0, kind: input, shape index: {}]   ;;  %s675_s1 = inlined_call_operand.hbm [shape: bf16[8,64], index: 1, kind: input, shape index: {}]   ;;  %s676_s2 = inlined_call_operand.vmem [shape: f32[1,64], index: 2, kind: input, shape index: {}]   ;;  %s677_s3 = inlined_call_operand.hbm [shape: bf16[64,64], index: 3, kind: input, shape index: {}]   ;;  %s678_s4 = inlined_call_operand.vmem [shape: f32[1,64], index: 4, kind: input, shape index: {}]   ;;  %s679_s5 = inlined_call_operand.hbm [shape: bf16[64,128], index: 5, kind: input, shape index: {}]   ;;  %s680_s6 = inlined_call_operand.vmem [shape: f32[1,128], index: 6, kind: input, shape index: {}]   ;;  %s681_s7 = inlined_call_operand.hbm [shape: bf16[2,128], index: 7, kind: output, shape index: {}]  }
   0x1   :  { %13 = vsyncpa [#allocation6], 0 }
   0x2   :  { %14 = vsyncpa [#allocation9], 0 }
   0x3   :  { %15 = vsyncpa [#allocation4], 0 }
   0x4   :  { %20 = vsyncadd [#allocation3], 224  ;;  %s591_s24 = smov [#allocation5]   ;;  %s592_s26 = smov [#allocation2]  }
   0x5   :  { %s34_s25 = sshll.u32 %s591_s24, 4  ;;  %s21_s27 = sshll.u32 %s592_s26, 4  ;;  %s35_s25 = int_to_ptr.vmem [resolvable:$true] %s34_s25  ;;  %s22_s27 = int_to_ptr.vmem [resolvable:$true] %s21_s27 }
   0x6   :  { %s491_s28 = scalar_lea.vmem %s35_s25, 64  ;;  %p496_p1 = scmp.lt.s32.totalorder %s35_s25, %s35_s25 }
   0x7   :  { %p492_p0 = scmp.ne.s32.totalorder %s35_s25, %s491_s28  ;;  %p497_p2 = scmp.lt.s32.totalorder %s491_s28, %s491_s28 }
   0x9   :  { %p498_p3 = por %p497_p2, %p496_p1 }
   0xb   :  { %p499_p4 = pnand %p498_p3, %p492_p0 }
   0xd   :  { %502 = shalt.err (!%p499_p4)
}
   0xe   :  { %37 = dma.hbm_to_vmem [thread:$0]  %s675_s1, 64, %s35_s25, [#allocation6]  }
   0xf   :  { %s511_s8 = scalar_lea.vmem %s22_s27, 32  ;;  %s515_s9 = scalar_lea.vmem %s22_s27, 256 }
  0x10   :  { %p512_p5 = scmp.ne.s32.totalorder %s22_s27, %s511_s8  ;;  %p516_p6 = scmp.lt.s32.totalorder %s22_s27, %s22_s27 }
  0x11   :  { %p517_p7 = scmp.lt.s32.totalorder %s515_s9, %s511_s8 }
  0x13   :  { %p518_p8 = por %p517_p7, %p516_p6 }
  0x15   :  { %p519_p9 = pnand %p518_p8, %p512_p5 }
  0x17   :  { %522 = shalt.err (!%p519_p9)
}
  0x18   :  { %s593_s10 = smov 32   ;;  %s594_s11 = smov 2  }
  0x19   :  { %27 = dma.hbm_to_vmem [thread:$0]  %s674_s0, 32, %s22_s27, [#allocation3], %s593_s10, %s593_s10, %s594_s11  }
  0x1a   :  { %s595_s14 = smov [#allocation7]  }
  0x1b   :  { %s45_s15 = sshll.u32 %s595_s14, 4  ;;  %s46_s15 = int_to_ptr.vmem [resolvable:$true] %s45_s15 }
  0x1c   :  { %s531_s16 = scalar_lea.vmem %s46_s15, 512  ;;  %p536_p11 = scmp.lt.s32.totalorder %s46_s15, %s46_s15 }
  0x1d   :  { %p532_p10 = scmp.ne.s32.totalorder %s46_s15, %s531_s16  ;;  %p537_p12 = scmp.lt.s32.totalorder %s531_s16, %s531_s16 }
  0x1f   :  { %p538_p13 = por %p537_p12, %p536_p11 }
  0x21   :  { %p539_p0 = pnand %p538_p13, %p532_p10 }
  0x23   :  { %542 = shalt.err (!%p539_p0)
}
  0x24   :  { %s596_s1 = smov 64   ;;  %s597_s17 = smov 4  }
  0x25   :  { %51 = dma.hbm_to_vmem [thread:$0]  %s677_s3, 512, %s46_s15, [#allocation6], %s596_s1, %s596_s1, %s597_s17  }
  0x26   :  { %s598_s20 = smov [#allocation8]  }
  0x27   :  { %s59_s21 = sshll.u32 %s598_s20, 4  ;;  %s60_s21 = int_to_ptr.vmem [resolvable:$true] %s59_s21 }
  0x28   :  { %s551_s0 = scalar_lea.vmem %s60_s21, 512  ;;  %p556_p2 = scmp.lt.s32.totalorder %s60_s21, %s60_s21 }
  0x29   :  { %p552_p1 = scmp.ne.s32.totalorder %s60_s21, %s551_s0  ;;  %p557_p3 = scmp.lt.s32.totalorder %s551_s0, %s551_s0 }
  0x2b   :  { %p558_p4 = por %p557_p3, %p556_p2 }
  0x2d   :  { %p559_p5 = pnand %p558_p4, %p552_p1 }
  0x2f   :  { %562 = shalt.err (!%p559_p5)
}
  0x30   :  { %65 = dma.hbm_to_vmem [thread:$0]  %s679_s5, 512, %s60_s21, [#allocation9], %s596_s1, %s596_s1, %s597_s17  }
  0x31   :  { %583 = dma.done.wait [#allocation3], 256  }
  0x32   :  { %584 = vsyncadd [#allocation3], 4294967040 }
  0x33   :  { %585 = dma.done.wait [#allocation6], 576  }
  0x34   :  { %586 = vsyncadd [#allocation6], 4294966720 }
  0x35   :  { %587 = dma.done.wait [#allocation9], 512  }
  0x36   :  { %588 = vsyncadd [#allocation9], 4294966784  ;;  %v599_v0 = vmov 0.0   ;;  %vm600_vm0 = vmmov 0   ;;  %vm96_vm1 = vcmask 1043456   ;;  %v81_v2 = vld [vmem:[#allocation2] sm:$0xff]  ;;  %v320_v36 = vlaneseq }
  0x37   :  { %431 = vmatprep.subr.bf16.mxu0 %v599_v0  ;;  %433 = vmatprep.mubr.msk.bf16.mxu0 %vm600_vm0, %v599_v0  ;;  %v84_v1 = vld [vmem:[#allocation5] sm:$0xf]  ;;  %v82_v3 = vld [vmem:[#allocation2 + $0x8] sm:$0xff]  ;;  %vm92_vm2 = vcmask 64512   ;;  %v477_v8 = vld [vmem:[#allocation7 + $0x8] sm:$0xff]   ;;  %vm183_vm3 = vcmask 523264  }
  0x38   :  { %437 = vmatprep.subr.bf16.mxu1 %v599_v0  ;;  %445 = vmatprep.mubr.msk.bf16.mxu1 %vm600_vm0, %v599_v0  ;;  %v98_v4 = vsel %vm96_vm1, %v84_v1, 0  ;;  %v83_v5 = vpack.c.bf16 %v82_v3, %v81_v2  ;;  %v475_v6 = vld [vmem:[#allocation7 + $0x18] sm:$0xff]   ;;  %v476_v7 = vld [vmem:[#allocation7 + $0x10] sm:$0xff]   ;;  %v478_v9 = vld [vmem:[#allocation7] sm:$0xff]   ;;  %v601_v34 = vmov 1966171168  }
  0x39   :  { %432 = vmatpush3.bf16.msra.mxu0 %v98_v4  ;;  %438 = vmatpush3.bf16.msra.mxu1 %v475_v6  ;;  %v479_v10 = vld [vmem:[#allocation8 + $0x18] sm:$0xff]   ;;  %v400_v11 = vld [vmem:[%s676_s2] ss:$0 sm:$0xff]  ;;  %v480_v21 = vld [vmem:[#allocation8 + $0x10] sm:$0xff]   ;;  %v318_v35 = vunpack.c.l.s4 %v601_v34  ;;  %v321_v39 = vshrl.u32 %v320_v36, 7 }
  0x3a   :  { %449 = vmatprep.subr.bf16.mxu0 %v599_v0  ;;  %439 = vmatprep.subr.bf16.mxu1 %v599_v0  ;;  %v481_v22 = vld [vmem:[#allocation8 + $0x8] sm:$0xff]   ;;  %v482_v23 = vld [vmem:[#allocation8] sm:$0xff]  }
  0x3b   :  { %v402_v24 = vld [vmem:[%s678_s4] ss:$0 sm:$0xff]  ;;  %v319_v38 = vunpack.c.0.s8 %v318_v35 }
  0x3c   :  { %434 = vmatmul.mubr.msk.bf16.vlgmr.msra.gmra.mxu0 %vm92_vm2, %v83_v5  ;;  %v408_v40 = vld [vmem:[%s680_s6] ss:$0 sm:$0xff] }
  0x3d   :  { %457 = vmatprep.mubr.msk.bf16.mxu0 %vm600_vm0, %v599_v0  ;;  %440 = vmatpush3.bf16.msra.mxu1 %v476_v7  ;;  %v322_v45 = vsub.s32 %v319_v38, %v321_v39 }
  0x3e   :  { %441 = vmatprep.subr.bf16.mxu1 %v599_v0  ;;  %450 = vmatpush3.bf16.msra.mxu0 %v479_v10 }
  0x3f   :  { %451 = vmatprep.subr.bf16.mxu0 %v599_v0 }
  0x41   :  { %442 = vmatpush3.bf16.msra.mxu1 %v477_v8 }
  0x42   :  { %443 = vmatprep.subr.bf16.mxu1 %v599_v0  ;;  %452 = vmatpush3.bf16.msra.mxu0 %v480_v21 }
  0x43   :  { %453 = vmatprep.subr.bf16.mxu0 %v599_v0 }
  0x45   :  { %444 = vmatpush3.bf16.msra.mxu1 %v478_v9 }
  0x46   :  { %454 = vmatpush3.bf16.msra.mxu0 %v481_v22 }
  0x47   :  { %455 = vmatprep.subr.bf16.mxu0 %v599_v0 }
  0x4a   :  { %456 = vmatpush3.bf16.msra.mxu0 %v482_v23 }
  0xfc   :  { %v134_v12 = vpop.f32.mrf.mxu0 }
  0xfd   :  { %v135_v14 = vadd.f32 %v400_v11, %v134_v12 }
  0xfe   :  { %v435_v13 = vpop.f32.mrf.mxu0 }
  0xff   :  { %v141_v18 = vmax.f32 %v135_v14, 0.0 }
 0x100   :  { %v137_v15 = vpop.f32.mrf.mxu0 }
 0x101   :  { %v138_v16 = vadd.f32 %v400_v11, %v137_v15 }
 0x102   :  { %v436_v17 = vpop.f32.mrf.mxu0 }
 0x103   :  { %v142_v19 = vmax.f32 %v138_v16, 0.0 }
 0x105   :  { %v143_v20 = vpack.c.bf16 %v142_v19, %v141_v18 }
 0x107   :  { %446 = vmatmul.mubr.msk.bf16.vlgmr.msra.gmra.mxu1 %vm183_vm3, %v143_v20 }
 0x1c7   :  { %v221_v25 = vpop.f32.mrf.mxu1 }
 0x1c8   :  { %v222_v27 = vadd.f32 %v402_v24, %v221_v25 }
 0x1c9   :  { %v447_v26 = vpop.f32.mrf.mxu1 }
 0x1ca   :  { %v228_v31 = vmax.f32 %v222_v27, 0.0 }
 0x1cb   :  { %v224_v28 = vpop.f32.mrf.mxu1 }
 0x1cc   :  { %v225_v29 = vadd.f32 %v402_v24, %v224_v28 }
 0x1cd   :  { %v448_v30 = vpop.f32.mrf.mxu1 }
 0x1ce   :  { %v229_v32 = vmax.f32 %v225_v29, 0.0 }
 0x1d0   :  { %v230_v33 = vpack.c.bf16 %v229_v32, %v228_v31 }
 0x1d2   :  { %458 = vmatmul.mubr.msk.bf16.vlgmr.msra.gmra.mxu0 %vm183_vm3, %v230_v33 }
 0x292   :  { %v307_v37 = vpop.f32.mrf.mxu0 }
 0x293   :  { %v308_v43 = vadd.f32 %v408_v40, %v307_v37 }
 0x294   :  { %v459_v41 = vpop.f32.mrf.mxu0 }
 0x296   :  { %v310_v42 = vpop.f32.mrf.mxu0 }
 0x297   :  { %v311_v44 = vadd.f32 %v408_v40, %v310_v42 }
 0x298   :  { %v460_v46 = vpop.f32.mrf.mxu0 }
 0x299   :  { %v314_v47 = vpack.c.bf16 %v311_v44, %v308_v43  ;;  %v414_v48 = vpack.c.bf16 %v311_v44, %v311_v44 }
 0x29b   :  { %v323_v49 = vrot.slane %v314_v47, %v322_v45  ;;  %v330_v50 = vrot.slane %v414_v48, %v322_v45 }
 0x29d   :  { %v331_v51 = vcombine.high %v323_v49, %v323_v49  ;;  %v332_v52 = vcombine.high %v330_v50, %v330_v50  ;;  %v339_v53 = vrot.slane %v323_v49, %v322_v45  ;;  %v346_v54 = vrot.slane %v330_v50, %v322_v45  ;;  %415 = vst.sshfl [vmem:[#allocation10] sm:$0x1 pattern:$0x73625140] %v323_v49 }
 0x29e   :  { %417 = vst.sshfl [vmem:[#allocation10 + $0x4] sm:$0x1 pattern:$0x73625140] %v330_v50 }
 0x29f   :  { %v353_v55 = vrot.slane %v331_v51, %v322_v45  ;;  %v360_v56 = vrot.slane %v332_v52, %v322_v45  ;;  %v361_v57 = vcombine.high %v339_v53, %v339_v53  ;;  %v362_v58 = vcombine.high %v346_v54, %v346_v54  ;;  %416 = vst.sshfl [vmem:[#allocation10 + $0x1] sm:$0x1 pattern:$0x73625140] %v331_v51 }
 0x2a0   :  { %418 = vst.sshfl [vmem:[#allocation10 + $0x5] sm:$0x1 pattern:$0x73625140] %v332_v52 }
 0x2a1   :  { %v363_v59 = vcombine.high %v353_v55, %v353_v55  ;;  %v364_v60 = vcombine.high %v360_v56, %v360_v56  ;;  %375 = vst [vmem:[#allocation10 + $0x2] sm:$0x1] %v361_v57  ;;  %379 = vst [vmem:[#allocation10 + $0x6] sm:$0x1] %v362_v58 }
 0x2a3   :  { %376 = vst [vmem:[#allocation10 + $0x3] sm:$0x1] %v363_v59  ;;  %380 = vst [vmem:[#allocation10 + $0x7] sm:$0x1] %v364_v60 }
 0x2a4   :  { %385 = vsyncadd [#allocation4], 112  ;;  %s602_s4 = smov [#allocation10]  }
 0x2a5   :  { %s386_s6 = sshll.u32 %s602_s4, 4  ;;  %s387_s6 = int_to_ptr.vmem [resolvable:$true] %s386_s6 }
 0x2a6   :  { %s563_s27 = scalar_lea.vmem %s387_s6, 16  ;;  %s567_s28 = scalar_lea.vmem %s387_s6, 128 }
 0x2a7   :  { %p564_p6 = scmp.ne.s32.totalorder %s387_s6, %s563_s27  ;;  %p568_p7 = scmp.lt.s32.totalorder %s387_s6, %s387_s6 }
 0x2a8   :  { %p569_p8 = scmp.lt.s32.totalorder %s567_s28, %s563_s27 }
 0x2aa   :  { %p570_p9 = por %p569_p8, %p568_p7 }
 0x2ac   :  { %p571_p10 = pnand %p570_p9, %p564_p6 }
 0x2ae   :  { %574 = shalt.err (!%p571_p10)
}
 0x2af   :  { %s603_s29 = smov 16   ;;  %s604_s30 = smov 1  }
 0x2b0   :  { %392 = dma.vmem_to_hbm [thread:$0]  %s387_s6, 16, %s681_s7, [#allocation4], %s603_s29, %s603_s29, %s604_s30  }
 0x2b1   :  { %589 = dma.done.wait [#allocation4], 128  }
 0x2b2   :  { %590 = vsyncadd [#allocation4], 4294967168 }
 0x2b3   :  { %396 = vsyncpa [#allocation3], 1 }
 0x2b4   :  { %397 = vsyncpa [#allocation6], 1 }
 0x2b5   :  { %398 = vsyncpa [#allocation9], 1 }
 0x2b6   :  { %399 = vsyncpa [#allocation4], 1 }

</bundles_post_ra>
